<compile_context>
chip_gen: v7x
topology: tpu7x:2x2x1
jax: 0.10.0
libtpu: 0.0.40
codegen_flags: <defaults>
</compile_context>

<pallas_src>
import functools

import jax
import jax.numpy as jnp
from jax.experimental import pallas as pl
from jax.experimental.pallas import tpu as pltpu

LANE = 128


def _round_up(x, m):
    return (x + m - 1) // m * m


def _vmem_limit_bytes():
    # v5e/v6e: 128 MiB physical -> ~96 MiB; v7x: 64 MiB -> ~48 MiB.
    try:
        cap = pltpu.get_tpu_info().vmem_capacity_bytes
    except Exception:
        cap = 128 * 1024 * 1024
    return int(min(cap * 3 // 4, 100 * 1024 * 1024))


def _pick_cb(cp, cout_block):
    cb = min(cp, cout_block)
    if cp % cb:
        cb = LANE
    return cb


# ----------------------------------------------------------------------------
# Kernel A: stride-1 3x3 conv + BN(scale/bias on f32 acc) + ReLU, writing the
# result straight into the NEXT conv's zero-padded flat input canvas.
# ----------------------------------------------------------------------------
def _conv3x3_bn_relu_kernel(x_ref, w_ref, s_ref, b_ref, o_ref, *,
                            wp, wo, m_out, out_off):
    # x_ref: (Hp*Wp, Cin) bf16 flattened zero-padded image (pad=1 + 1 extra
    # bottom row).  Tap (kh,kw) for output raster index m is the contiguous
    # slice starting at kh*Wp + kw  ->  no im2col.
    acc = None
    for kh in range(3):
        for kw in range(3):
            off = kh * wp + kw
            tap = x_ref[off:off + m_out, :]
            d = jnp.dot(tap, w_ref[kh * 3 + kw],
                        preferred_element_type=jnp.float32)
            acc = d if acc is None else acc + d
    y = jnp.maximum(acc * s_ref[...] + b_ref[...], 0.0)
    # Zero the invalid raster columns (w' >= Wo) so they become valid zero
    # padding of the next conv's canvas.
    col = jax.lax.broadcasted_iota(jnp.int32, (m_out, 1), 0) % wp
    y = jnp.where(col < wo, y, 0.0).astype(o_ref.dtype)
    o_ref[...] = jnp.zeros(o_ref.shape, o_ref.dtype)
    o_ref[out_off:out_off + m_out, :] = y


def conv3x3_bn_relu(xp_flat, w9, scale, bias, *, hp, wp, ho, wo,
                    cout_block=256):
    N, mflat, cin = xp_flat.shape
    assert mflat == hp * wp and mflat >= 2 * wp + 2 + ho * wp
    cp = w9.shape[-1]
    cb = _pick_cb(cp, cout_block)
    m_out = ho * wp
    m_canvas = (ho + 3) * wp
    kernel = functools.partial(_conv3x3_bn_relu_kernel, wp=wp, wo=wo,
                               m_out=m_out, out_off=wp + 1)
    return pl.pallas_call(
        kernel,
        out_shape=jax.ShapeDtypeStruct((N, m_canvas, cp), jnp.bfloat16),
        grid=(N, cp // cb),
        in_specs=[
            pl.BlockSpec((None, mflat, cin), lambda n, j: (n, 0, 0)),
            pl.BlockSpec((9, cin, cb), lambda n, j: (0, 0, j)),
            pl.BlockSpec((1, cb), lambda n, j: (0, j)),
            pl.BlockSpec((1, cb), lambda n, j: (0, j)),
        ],
        out_specs=pl.BlockSpec((None, m_canvas, cb), lambda n, j: (n, 0, j)),
        compiler_params=pltpu.CompilerParams(
            dimension_semantics=("parallel", "parallel"),
            vmem_limit_bytes=_vmem_limit_bytes()),
    )(xp_flat, w9, scale, bias)


# ----------------------------------------------------------------------------
# Kernel B: 3x3 conv + BN + shortcut (identity or 1x1-conv+BN) + ReLU, fused.
# The shortcut is an extra MXU tap with its own weight / scale / bias.
# ----------------------------------------------------------------------------
def _conv3x3_bn_shortcut_relu_kernel(x_ref, w_ref, s_ref, b_ref,
                                     sc_ref, wsc_ref, ssc_ref, bsc_ref,
                                     o_ref, *, wp, m_out, sc_off):
    acc = None
    for kh in range(3):
        for kw in range(3):
            off = kh * wp + kw
            tap = x_ref[off:off + m_out, :]
            d = jnp.dot(tap, w_ref[kh * 3 + kw],
                        preferred_element_type=jnp.float32)
            acc = d if acc is None else acc + d
    y = acc * s_ref[...] + b_ref[...]
    sc = jnp.dot(sc_ref[sc_off:sc_off + m_out, :], wsc_ref[...],
                 preferred_element_type=jnp.float32)
    y = y + sc * ssc_ref[...] + bsc_ref[...]
    o_ref[...] = jnp.maximum(y, 0.0).astype(o_ref.dtype)


def conv3x3_bn_shortcut_relu(canvas, w9, scale, bias, sc, wsc, ssc, bsc, *,
                             wp, ho, sc_off, cout_block=256):
    N, mflat, cmid = canvas.shape
    m_out = ho * wp
    assert mflat >= 2 * wp + 2 + m_out
    cp = w9.shape[-1]
    cb = _pick_cb(cp, cout_block)
    _, msc, csc = sc.shape
    assert msc >= sc_off + m_out
    kernel = functools.partial(_conv3x3_bn_shortcut_relu_kernel, wp=wp,
                               m_out=m_out, sc_off=sc_off)
    return pl.pallas_call(
        kernel,
        out_shape=jax.ShapeDtypeStruct((N, m_out, cp), jnp.bfloat16),
        grid=(N, cp // cb),
        in_specs=[
            pl.BlockSpec((None, mflat, cmid), lambda n, j: (n, 0, 0)),
            pl.BlockSpec((9, cmid, cb), lambda n, j: (0, 0, j)),
            pl.BlockSpec((1, cb), lambda n, j: (0, j)),
            pl.BlockSpec((1, cb), lambda n, j: (0, j)),
            pl.BlockSpec((None, msc, csc), lambda n, j: (n, 0, 0)),
            pl.BlockSpec((csc, cb), lambda n, j: (0, j)),
            pl.BlockSpec((1, cb), lambda n, j: (0, j)),
            pl.BlockSpec((1, cb), lambda n, j: (0, j)),
        ],
        out_specs=pl.BlockSpec((None, m_out, cb), lambda n, j: (n, 0, j)),
        compiler_params=pltpu.CompilerParams(
            dimension_semantics=("parallel", "parallel"),
            vmem_limit_bytes=_vmem_limit_bytes()),
    )(canvas, w9, scale, bias, sc, wsc, ssc, bsc)


# ----------------------------------------------------------------------------
# Kernel C: fused GEMM + BN + ReLU (only used for the stride-2 conv1).
# No host M padding, ragged last tile handled by the pl.cdiv grid.
# ----------------------------------------------------------------------------
def _gemm_bn_relu_kernel(p_ref, w_ref, s_ref, b_ref, o_ref):
    acc = jnp.dot(p_ref[...], w_ref[...], preferred_element_type=jnp.float32)
    o_ref[...] = jnp.maximum(acc * s_ref[...] + b_ref[...], 0.0
                             ).astype(o_ref.dtype)


def gemm_bn_relu(patches, w, scale, bias, *, tm=512):
    M, K = patches.shape
    Kw, cp = w.shape
    assert Kw == K and cp % LANE == 0
    tm = max(8, min(tm, _round_up(M, 8)))
    return pl.pallas_call(
        _gemm_bn_relu_kernel,
        out_shape=jax.ShapeDtypeStruct((M, cp), jnp.bfloat16),
        grid=(pl.cdiv(M, tm),),
        in_specs=[
            pl.BlockSpec((tm, K), lambda i: (i, 0)),
            pl.BlockSpec((K, cp), lambda i: (0, 0)),   # resident across M
            pl.BlockSpec((1, cp), lambda i: (0, 0)),
            pl.BlockSpec((1, cp), lambda i: (0, 0)),
        ],
        out_specs=pl.BlockSpec((tm, cp), lambda i: (i, 0)),
        compiler_params=pltpu.CompilerParams(
            dimension_semantics=("parallel",),
            vmem_limit_bytes=_vmem_limit_bytes()),
    )(patches, w, scale, bias)


# ----------------------------------------------------------------------------
# Host-side glue (one-time, cheap): layout, BN fold, weight packing.
# ----------------------------------------------------------------------------
def _bn_fold(bn, eps=1e-5):
    scale = bn["gamma"] / jnp.sqrt(bn["var"] + eps)
    bias = bn["beta"] - bn["mean"] * scale
    return scale, bias


def _pad_vec(v, cp):
    return jnp.pad(v, (0, cp - v.shape[0])).reshape(1, cp).astype(jnp.float32)


def _conv_w_taps(w_oihw, cin_pad, cout_pad):
    # OIHW -> (9, Cin_pad, Cout_pad) bf16, unscaled (BN scale stays in f32).
    cout, cin, kh, kw = w_oihw.shape
    w = jnp.transpose(w_oihw, (2, 3, 1, 0)).reshape(kh * kw, cin, cout)
    w = jnp.pad(w, ((0, 0), (0, cin_pad - cin), (0, cout_pad - cout)))
    return w.astype(jnp.bfloat16)


def _pad_flat_image(x_nhwc):
    # zero pad: top 1, bottom 2 (conv pad + raster-overrun row), left/right 1,
    # then flatten (H, W) -> one pixel axis.
    N, H, W, C = x_nhwc.shape
    xp = jnp.pad(x_nhwc, ((0, 0), (1, 2), (1, 1), (0, 0)))
    return xp.reshape(N, (H + 3) * (W + 2), C)


def _im2col_3x3_s2(x_nhwc):
    # Only for the stride-2 conv1 of downsample blocks (~2.25x input bytes).
    N, H, W, C = x_nhwc.shape
    xp = jnp.pad(x_nhwc, ((0, 0), (1, 1), (1, 1), (0, 0)))
    ho = (H - 1) // 2 + 1
    wo = (W - 1) // 2 + 1
    cols = [xp[:, kh:kh + 2 * ho:2, kw:kw + 2 * wo:2, :]
            for kh in range(3) for kw in range(3)]
    p = jnp.stack(cols, axis=-2).reshape(N * ho * wo, 9 * C)
    return p, ho, wo


def _pad_k(p, w_km):
    K = p.shape[1]
    kp = _round_up(K, LANE)
    if kp != K:
        p = jnp.pad(p, ((0, 0), (0, kp - K)))
        w_km = jnp.pad(w_km, ((0, kp - K), (0, 0)))
    return p, w_km


# ----------------------------------------------------------------------------
# BasicBlock forward (inference: dropout = identity, BN uses running stats)
# ----------------------------------------------------------------------------
def basic_block_forward(x_nchw, params, stride, *, cout_block=256, tm=512):
    N, cin, H, W = x_nchw.shape
    planes = params["w1"].shape[0]
    cp = _round_up(planes, LANE)              # lane-dense output channels
    downsample = (stride != 1) or (cin != planes)

    ho = (H - 1) // stride + 1
    wo = (W - 1) // stride + 1
    wp = wo + 2                               # padded raster width for conv2

    x_nhwc = jnp.transpose(x_nchw, (0, 2, 3, 1)).astype(jnp.bfloat16)
    scale1, bias1 = _bn_fold(params["bn1"])
    scale2, bias2 = _bn_fold(params["bn2"])

    xp_flat = None
    if stride == 1:
        # conv1 + bn1 + relu, in-kernel taps; result lands directly in conv2's
        # zero-padded flat canvas (no host re-pad of the activation).
        xp_flat = _pad_flat_image(x_nhwc)                 # (N,(H+3)(W+2),cin)
        w1 = _conv_w_taps(params["w1"], cin, cp)
        canvas = conv3x3_bn_relu(xp_flat, w1, _pad_vec(scale1, cp),
                                 _pad_vec(bias1, cp),
                                 hp=H + 3, wp=wp, ho=ho, wo=wo,
                                 cout_block=cout_block)
    else:
        # TODO(synk): stride-2 conv1 still uses a small host im2col GEMM.
        patches, ho2, wo2 = _im2col_3x3_s2(x_nhwc)
        assert (ho2, wo2) == (ho, wo)
        w1_km = jnp.transpose(params["w1"], (2, 3, 1, 0)).reshape(9 * cin,
                                                                  planes)
        w1_km = jnp.pad(w1_km, ((0, 0), (0, cp - planes)))
        patches, w1_km = _pad_k(patches, w1_km)
        out1 = gemm_bn_relu(patches, w1_km.astype(jnp.bfloat16),
                            _pad_vec(scale1, cp), _pad_vec(bias1, cp), tm=tm)
        canvas = _pad_flat_image(out1.reshape(N, ho, wo, cp))

    # dropout (p=0.3) is identity in eval mode.

    # conv2 + bn2 + shortcut + relu, fully fused in ONE kernel.
    w2 = _conv_w_taps(params["w2"], cp, cp)   # Cin padded to canvas channels
    if downsample:
        xsc = x_nhwc[:, ::stride, ::stride, :]                 # (N,ho,wo,cin)
        xsc = jnp.pad(xsc, ((0, 0), (0, 0), (0, 2), (0, 0)))   # align to wp
        sc = xsc.reshape(N, ho * wp, cin)
        wsc = jnp.transpose(params["w_sc"][:, :, 0, 0], (1, 0))  # (cin,planes)
        wsc = jnp.pad(wsc, ((0, 0), (0, cp - planes))).astype(jnp.bfloat16)
        ssc, bsc = _bn_fold(params["bn_sc"])
        ssc, bsc = _pad_vec(ssc, cp), _pad_vec(bsc, cp)
        sc_off = 0
    else:
        # Identity shortcut: reuse conv1's padded flat input, shifted by wp+1,
        # as an extra tap with an eye() weight (bf16, un-padded channels, no
        # extra HBM materialisation).
        sc = xp_flat
        wsc = jnp.eye(cin, cp, dtype=jnp.bfloat16)
        ssc = jnp.ones((1, cp), jnp.float32)
        bsc = jnp.zeros((1, cp), jnp.float32)
        sc_off = wp + 1

    out = conv3x3_bn_shortcut_relu(
        canvas, w2, _pad_vec(scale2, cp), _pad_vec(bias2, cp),
        sc, wsc, ssc, bsc, wp=wp, ho=ho, sc_off=sc_off, cout_block=cout_block)

    out = out.reshape(N, ho, wp, cp)[:, :, :wo, :planes]
    return jnp.transpose(out, (0, 3, 1, 2)).astype(jnp.float32)


# ----------------------------------------------------------------------------
# Pure-JAX f32 reference (NCHW, PyTorch semantics, eval mode)
# ----------------------------------------------------------------------------
def ref_forward(x, params, stride):
    def conv(x, w, s, pad):
        return jax.lax.conv_general_dilated(
            x, w, (s, s), ((pad, pad), (pad, pad)),
            dimension_numbers=("NCHW", "OIHW", "NCHW"),
            precision=jax.lax.Precision.HIGHEST)

    def bn(x, p, eps=1e-5):
        scale = p["gamma"] / jnp.sqrt(p["var"] + eps)
        bias = p["beta"] - p["mean"] * scale
        return x * scale[None, :, None, None] + bias[None, :, None, None]

    out = jax.nn.relu(bn(conv(x, params["w1"], stride, 1), params["bn1"]))
    out = bn(conv(out, params["w2"], 1, 1), params["bn2"])
    if "w_sc" in params:
        sc = bn(conv(x, params["w_sc"], stride, 0), params["bn_sc"])
    else:
        sc = x
    return jax.nn.relu(out + sc)


# ----------------------------------------------------------------------------
# Deterministic parameter construction
# ----------------------------------------------------------------------------
def make_params(key, in_planes, planes, stride):
    def bn_params(c, off):
        return {
            "gamma": 1.0 + 0.1 * jnp.arange(c, dtype=jnp.float32) + off,
            "beta": 0.05 * jnp.arange(c, dtype=jnp.float32) - 0.1,
            "mean": 0.01 * jnp.arange(c, dtype=jnp.float32),
            "var": 1.0 + 0.02 * jnp.arange(c, dtype=jnp.float32),
        }

    k1, k2, k3 = jax.random.split(key, 3)
    params = {
        "w1": 0.1 * jax.random.normal(k1, (planes, in_planes, 3, 3),
                                      jnp.float32),
        "bn1": bn_params(planes, 0.0),
        "w2": 0.1 * jax.random.normal(k2, (planes, planes, 3, 3), jnp.float32),
        "bn2": bn_params(planes, 0.1),
    }
    if stride != 1 or in_planes != planes:
        params["w_sc"] = 0.1 * jax.random.normal(
            k3, (planes, in_planes, 1, 1), jnp.float32)
        params["bn_sc"] = bn_params(planes, 0.2)
    return params


if __name__ == "__main__":
    key = jax.random.PRNGKey(0)

    # Config 1: downsample block (stride 2, channel expansion, fused 1x1+BN
    # shortcut tap).
    kx, kp = jax.random.split(jax.random.fold_in(key, 0))
    N, in_planes, H, W = 2, 4, 16, 16
    planes, stride = 8, 2
    x = jax.random.normal(kx, (N, in_planes, H, W), jnp.float32)
    params = make_params(kp, in_planes, planes, stride)
    out = jax.block_until_ready(basic_block_forward(x, params, stride))
    ref = jax.block_until_ready(ref_forward(x, params, stride))
    assert out.shape == ref.shape == (N, planes, H // stride, W // stride)
    assert jnp.allclose(out, ref, atol=5e-2, rtol=5e-2), \
        float(jnp.max(jnp.abs(out - ref)))

    # Config 2: identity-shortcut block (stride 1, residual added in-kernel as
    # an eye-weight tap).
    kx, kp = jax.random.split(jax.random.fold_in(key, 1))
    N, in_planes, H, W = 2, 8, 16, 16
    planes, stride = 8, 1
    x = jax.random.normal(kx, (N, in_planes, H, W), jnp.float32)
    params = make_params(kp, in_planes, planes, stride)
    out = jax.block_until_ready(basic_block_forward(x, params, stride))
    ref = jax.block_until_ready(ref_forward(x, params, stride))
    assert out.shape == ref.shape == (N, planes, H, W)
    assert jnp.allclose(out, ref, atol=5e-2, rtol=5e-2), \
        float(jnp.max(jnp.abs(out - ref)))

    print("KERNEL_OK")
</pallas_src>

<mosaic_0001>
module attributes {stable_mosaic.version = 11 : i64} {
  func.func @_gemm_bn_relu_kernel(%arg0: i32, %arg1: memref<128x128xbf16, #tpu.memory_space<vmem>>, %arg2: memref<128x128xbf16, #tpu.memory_space<vmem>>, %arg3: memref<1x128xf32, #tpu.memory_space<vmem>>, %arg4: memref<1x128xf32, #tpu.memory_space<vmem>>, %arg5: memref<128x128xbf16, #tpu.memory_space<vmem>>) attributes {dimension_semantics = [#tpu.dimension_semantics<parallel>], iteration_bounds = array<i64: 1>, scalar_prefetch = 0 : i64, scratch_operands = 0 : i64, tpu.core_type = #tpu.core_type<tc>, window_params = [{transform_indices = @transform_0, window_bounds = array<i64: 128, 128>}, {pipeline_mode = #tpu.pipeline_mode<synchronous>, transform_indices = @transform_1, window_bounds = array<i64: 128, 128>}, {pipeline_mode = #tpu.pipeline_mode<synchronous>, transform_indices = @transform_2, window_bounds = array<i64: 1, 128>}, {pipeline_mode = #tpu.pipeline_mode<synchronous>, transform_indices = @transform_3, window_bounds = array<i64: 1, 128>}, {transform_indices = @transform_4, window_bounds = array<i64: 128, 128>}]} {
    %c0 = arith.constant 0 : index
    %c0_0 = arith.constant 0 : index
    %0 = vector.load %arg1[%c0, %c0_0] : memref<128x128xbf16, #tpu.memory_space<vmem>>, vector<128x128xbf16>
    %c0_1 = arith.constant 0 : index
    %c0_2 = arith.constant 0 : index
    %1 = vector.load %arg2[%c0_1, %c0_2] : memref<128x128xbf16, #tpu.memory_space<vmem>>, vector<128x128xbf16>
    %cst = arith.constant dense<0.000000e+00> : vector<128x128xf32>
    %2 = tpu.matmul %0, %1, %cst {dimension_numbers = #tpu.dot_dimension_numbers<[1], [0], [0], [1], [0, 0, 1, 1], [], []>} : vector<128x128xbf16>, vector<128x128xbf16>, vector<128x128xf32> -> vector<128x128xf32>
    %c0_3 = arith.constant 0 : index
    %c0_4 = arith.constant 0 : index
    %3 = vector.load %arg3[%c0_3, %c0_4] : memref<1x128xf32, #tpu.memory_space<vmem>>, vector<1x128xf32>
    %4 = vector.broadcast %3 : vector<1x128xf32> to vector<128x128xf32>
    %5 = arith.mulf %2, %4 : vector<128x128xf32>
    %c0_5 = arith.constant 0 : index
    %c0_6 = arith.constant 0 : index
    %6 = vector.load %arg4[%c0_5, %c0_6] : memref<1x128xf32, #tpu.memory_space<vmem>>, vector<1x128xf32>
    %7 = vector.broadcast %6 : vector<1x128xf32> to vector<128x128xf32>
    %8 = arith.addf %5, %7 : vector<128x128xf32>
    %cst_7 = arith.constant 0.000000e+00 : f32
    %9 = vector.broadcast %cst_7 : f32 to vector<128x128xf32>
    %10 = arith.maximumf %8, %9 : vector<128x128xf32>
    %11 = arith.truncf %10 : vector<128x128xf32> to vector<128x128xbf16>
    %c0_8 = arith.constant 0 : index
    %c0_9 = arith.constant 0 : index
    %12 = vector.load %arg5[%c0_8, %c0_9] : memref<128x128xbf16, #tpu.memory_space<vmem>>, vector<128x128xbf16>
    tpu.vector_store %arg5[%c0_8, %c0_9], %11 {strides = array<i32>} : memref<128x128xbf16, #tpu.memory_space<vmem>>, vector<128x128xbf16>,
    return
  }
  func.func @transform_0(%arg0: i32) -> (i32, i32) {
    %c0_i32 = arith.constant 0 : i32
    %c0_i32_0 = arith.constant 0 : i32
    return %arg0, %c0_i32 : i32, i32
  }
  func.func @transform_1(%arg0: i32) -> (i32, i32) {
    %c0_i32 = arith.constant 0 : i32
    %c0_i32_0 = arith.constant 0 : i32
    %c0_i32_1 = arith.constant 0 : i32
    return %c0_i32, %c0_i32_0 : i32, i32
  }
  func.func @transform_2(%arg0: i32) -> (i32, i32) {
    %c0_i32 = arith.constant 0 : i32
    %c0_i32_0 = arith.constant 0 : i32
    %c0_i32_1 = arith.constant 0 : i32
    return %c0_i32, %c0_i32_0 : i32, i32
  }
  func.func @transform_3(%arg0: i32) -> (i32, i32) {
    %c0_i32 = arith.constant 0 : i32
    %c0_i32_0 = arith.constant 0 : i32
    %c0_i32_1 = arith.constant 0 : i32
    return %c0_i32, %c0_i32_0 : i32, i32
  }
  func.func @transform_4(%arg0: i32) -> (i32, i32) {
    %c0_i32 = arith.constant 0 : i32
    %c0_i32_0 = arith.constant 0 : i32
    return %arg0, %c0_i32 : i32, i32
  }
}

</mosaic_0001>

<bundles_post_ra>
// kernel: tpu_custom_call.1
= control target key start
LH: loop header
LB: loop body
LE: loop exit
PB: predicated region body
PF: predicated region fallthrough
CT: control target
= control target key end

     0   :  { %9 = vsyncpa [#allocation3], 0  ;;  %s884_s0 = inlined_call_operand.hbm [shape: bf16[128,128], index: 0, kind: input, shape index: {}]   ;;  %s885_s1 = inlined_call_operand.hbm [shape: bf16[128,128], index: 1, kind: input, shape index: {}]   ;;  %s886_s2 = inlined_call_operand.hbm [shape: f32[1,128], index: 2, kind: input, shape index: {}]   ;;  %s887_s3 = inlined_call_operand.hbm [shape: f32[1,128], index: 3, kind: input, shape index: {}]   ;;  %s888_s4 = inlined_call_operand.hbm [shape: bf16[128,128], index: 4, kind: output, shape index: {}]  }
   0x1   :  { %10 = vsyncpa [#allocation6], 0 }
   0x2   :  { %11 = vsyncpa [#allocation9], 0 }
   0x3   :  { %12 = vsyncpa [#allocation4], 0  ;;  %s758_s15 = smov [#allocation5]   ;;  %s759_s17 = smov [#allocation2]  }
   0x4   :  { %s30_s16 = sshll.u32 %s758_s15, 4  ;;  %s18_s18 = sshll.u32 %s759_s17, 4  ;;  %s31_s16 = int_to_ptr.vmem [resolvable:$true] %s30_s16  ;;  %s790_s18 = int_to_ptr.vmem [resolvable:$true] %s18_s18 }
   0x5   :  { %s640_s21 = scalar_lea.hbm %s885_s1, 1024 }
   0x6   :  { %p641_p0 = scmp.ne.s32.totalorder %s885_s1, %s640_s21  ;;  %p644_p1 = scmp.lt.u32.totalorder %s640_s21, %s885_s1 }
   0x8   :  { %p646_p2 = pnand %p644_p1, %p641_p0 }
   0xa   :  { %649 = shalt.err (!%p646_p2)
}
   0xb   :  { %s650_s26 = scalar_lea.vmem %s31_s16, 1024  ;;  %p655_p4 = scmp.lt.s32.totalorder %s31_s16, %s31_s16 }
   0xc   :  { %p651_p3 = scmp.ne.s32.totalorder %s31_s16, %s650_s26  ;;  %p656_p5 = scmp.lt.s32.totalorder %s650_s26, %s650_s26 }
   0xe   :  { %p657_p6 = por %p656_p5, %p655_p4 }
  0x10   :  { %p658_p7 = pnand %p657_p6, %p651_p3 }
  0x12   :  { %661 = shalt.err (!%p658_p7)
}
  0x13   :  { %s760_s27 = smov 64   ;;  %s761_s28 = smov 4  }
  0x14   :  { %36 = dma.hbm_to_vmem [thread:$0]  %s885_s1, 1024, %s31_s16, [#allocation6], %s760_s27, %s760_s27, %s761_s28  }
  0x15   :  { %s662_s7 = scalar_lea.hbm %s884_s0, 1024 }
  0x16   :  { %p663_p8 = scmp.ne.s32.totalorder %s884_s0, %s662_s7  ;;  %p666_p9 = scmp.lt.u32.totalorder %s662_s7, %s884_s0 }
  0x18   :  { %p668_p10 = pnand %p666_p9, %p663_p8 }
  0x1a   :  { %671 = shalt.err (!%p668_p10)
}
  0x1b   :  { %s672_s12 = scalar_lea.vmem %s790_s18, 1024  ;;  %p677_p12 = scmp.lt.s32.totalorder %s790_s18, %s790_s18 }
  0x1c   :  { %p673_p11 = scmp.ne.s32.totalorder %s790_s18, %s672_s12  ;;  %p678_p13 = scmp.lt.s32.totalorder %s672_s12, %s672_s12 }
  0x1e   :  { %p679_p0 = por %p678_p13, %p677_p12 }
  0x20   :  { %p680_p1 = pnand %p679_p0, %p673_p11 }
  0x22   :  { %683 = shalt.err (!%p680_p1)
}
  0x23   :  { %24 = dma.hbm_to_vmem [thread:$0]  %s884_s0, 1024, %s790_s18, [#allocation3], %s760_s27, %s760_s27, %s761_s28  }
  0x24   :  { %s762_s14 = smov [#allocation7]   ;;  %s763_s16 = smov [#allocation8]  }
  0x25   :  { %s43_s15 = sshll.u32 %s762_s14, 4  ;;  %s53_s17 = sshll.u32 %s763_s16, 4  ;;  %s44_s15 = int_to_ptr.vmem [resolvable:$true] %s43_s15  ;;  %s54_s17 = int_to_ptr.vmem [resolvable:$true] %s53_s17 }
  0x26   :  { %s684_s21 = scalar_lea.hbm %s886_s2, 16 }
  0x27   :  { %p685_p2 = scmp.ne.s32.totalorder %s886_s2, %s684_s21  ;;  %p688_p3 = scmp.lt.u32.totalorder %s684_s21, %s886_s2 }
  0x29   :  { %p690_p4 = pnand %p688_p3, %p685_p2 }
  0x2b   :  { %693 = shalt.err (!%p690_p4)
}
  0x2c   :  { %s694_s0 = scalar_lea.vmem %s44_s15, 16  ;;  %s698_s18 = scalar_lea.vmem %s44_s15, 32 }
  0x2d   :  { %p695_p5 = scmp.ne.s32.totalorder %s44_s15, %s694_s0  ;;  %p699_p6 = scmp.lt.s32.totalorder %s44_s15, %s44_s15 }
  0x2e   :  { %p700_p7 = scmp.lt.s32.totalorder %s698_s18, %s694_s0 }
  0x30   :  { %p701_p8 = por %p700_p7, %p699_p6 }
  0x32   :  { %p702_p9 = pnand %p701_p8, %p695_p5 }
  0x34   :  { %705 = shalt.err (!%p702_p9)
}
  0x35   :  { %46 = dma.hbm_to_vmem [thread:$0]  %s886_s2, 16, %s44_s15, [#allocation6]  }
  0x36   :  { %s706_s6 = scalar_lea.hbm %s887_s3, 16 }
  0x37   :  { %p707_p10 = scmp.ne.s32.totalorder %s887_s3, %s706_s6  ;;  %p710_p11 = scmp.lt.u32.totalorder %s706_s6, %s887_s3 }
  0x39   :  { %p712_p12 = pnand %p710_p11, %p707_p10 }
  0x3b   :  { %715 = shalt.err (!%p712_p12)
}
  0x3c   :  { %s716_s11 = scalar_lea.vmem %s54_s17, 16  ;;  %s720_s12 = scalar_lea.vmem %s54_s17, 32 }
  0x3d   :  { %p717_p13 = scmp.ne.s32.totalorder %s54_s17, %s716_s11  ;;  %p721_p0 = scmp.lt.s32.totalorder %s54_s17, %s54_s17 }
  0x3e   :  { %p722_p1 = scmp.lt.s32.totalorder %s720_s12, %s716_s11 }
  0x40   :  { %p723_p2 = por %p722_p1, %p721_p0 }
  0x42   :  { %p724_p3 = pnand %p723_p2, %p717_p13 }
  0x44   :  { %727 = shalt.err (!%p724_p3)
}
  0x45   :  { %56 = dma.hbm_to_vmem [thread:$0]  %s887_s3, 16, %s54_s17, [#allocation9]  }
  0x46   :  { %750 = dma.done.wait [#allocation3], 1024  }
  0x47   :  { %751 = vsyncadd [#allocation3], 4294966272 }
  0x48   :  { %752 = dma.done.wait [#allocation6], 1040  }
  0x49   :  { %753 = vsyncadd [#allocation6], 4294966256 }
  0x4a   :  { %754 = dma.done.wait [#allocation9], 16  }
  0x4b   :  { %755 = vsyncadd [#allocation9], 4294967280  ;;  %v624_v0 = vld [vmem:[#allocation5] sm:$0xff]   ;;  %v625_v1 = vld [vmem:[#allocation5 + $0x8] sm:$0xff]   ;;  %s764_s3 = smov [#allocation10]  }
  0x4c   :  { %569 = vmatprep.subr.bf16.mxu0 %v624_v0  ;;  %601 = vmatprep.subr.bf16.mxu1 %v624_v0  ;;  %v626_v2 = vld [vmem:[#allocation5 + $0x10] sm:$0xff]   ;;  %v627_v3 = vld [vmem:[#allocation5 + $0x18] sm:$0xff]   ;;  %v632_v4 = vld [vmem:[#allocation2] sm:$0xff]   ;;  %s442_s13 = sshll.u32 %s764_s3, 4  ;;  %s443_s13 = int_to_ptr.vmem [resolvable:$true] %s442_s13 }
  0x4d   :  { %570 = vmatpush3.bf16.msra.mxu0 %v624_v0  ;;  %609 = vmatpush3.bf16.msra.mxu1 %v624_v0  ;;  %v633_v5 = vld [vmem:[#allocation2 + $0x20] sm:$0xff]   ;;  %v629_v7 = vld [vmem:[#allocation5 + $0x28] sm:$0xff]   ;;  %v630_v8 = vld [vmem:[#allocation5 + $0x30] sm:$0xff]   ;;  %s728_s14 = scalar_lea.vmem %s443_s13, 1024  ;;  %p733_p5 = scmp.lt.s32.totalorder %s443_s13, %s443_s13 }
  0x4e   :  { %571 = vmatprep.subr.bf16.mxu0 %v625_v1  ;;  %602 = vmatprep.subr.bf16.mxu1 %v625_v1  ;;  %v628_v6 = vld [vmem:[#allocation5 + $0x20] sm:$0xff]   ;;  %v631_v9 = vld [vmem:[#allocation5 + $0x38] sm:$0xff]   ;;  %v634_v10 = vld [vmem:[#allocation2 + $0x8] sm:$0xff]   ;;  %p729_p4 = scmp.ne.s32.totalorder %s443_s13, %s728_s14  ;;  %p734_p6 = scmp.lt.s32.totalorder %s728_s14, %s728_s14 }
  0x4f   :  { %585 = vmatprep.mubr.bf16.mxu0 %v632_v4  ;;  %593 = vmatprep.mubr.bf16.mxu1 %v633_v5  ;;  %v635_v11 = vld [vmem:[#allocation2 + $0x28] sm:$0xff]   ;;  %v636_v12 = vld [vmem:[#allocation2 + $0x10] sm:$0xff]   ;;  %v638_v14 = vld [vmem:[#allocation2 + $0x18] sm:$0xff]  }
  0x50   :  { %v637_v13 = vld [vmem:[#allocation2 + $0x30] sm:$0xff]   ;;  %v639_v15 = vld [vmem:[#allocation2 + $0x38] sm:$0xff]   ;;  %v472_v16 = vld [vmem:[#allocation7] ss:$0 sm:$0xff]  ;;  %p735_p7 = por %p734_p6, %p733_p5 }
  0x51   :  { %572 = vmatpush3.bf16.msra.mxu0 %v625_v1  ;;  %610 = vmatpush3.bf16.msra.mxu1 %v625_v1  ;;  %v851_v18 = vld [vmem:[#allocation8] ss:$0 sm:$0xff] }
  0x52   :  { %573 = vmatprep.subr.bf16.mxu0 %v626_v2  ;;  %603 = vmatprep.subr.bf16.mxu1 %v626_v2  ;;  %p736_p8 = pnand %p735_p7, %p729_p4 }
  0x55   :  { %574 = vmatpush3.bf16.msra.mxu0 %v626_v2  ;;  %611 = vmatpush3.bf16.msra.mxu1 %v626_v2 }
  0x56   :  { %575 = vmatprep.subr.bf16.mxu0 %v627_v3  ;;  %604 = vmatprep.subr.bf16.mxu1 %v627_v3 }
  0x59   :  { %576 = vmatpush3.bf16.msra.mxu0 %v627_v3  ;;  %612 = vmatpush3.bf16.msra.mxu1 %v627_v3 }
  0x5a   :  { %577 = vmatprep.subr.bf16.mxu0 %v628_v6  ;;  %605 = vmatprep.subr.bf16.mxu1 %v628_v6 }
  0x5d   :  { %578 = vmatpush3.bf16.msra.mxu0 %v628_v6  ;;  %613 = vmatpush3.bf16.msra.mxu1 %v628_v6 }
  0x5e   :  { %579 = vmatprep.subr.bf16.mxu0 %v629_v7  ;;  %606 = vmatprep.subr.bf16.mxu1 %v629_v7 }
  0x61   :  { %580 = vmatpush3.bf16.msra.mxu0 %v629_v7  ;;  %614 = vmatpush3.bf16.msra.mxu1 %v629_v7 }
  0x62   :  { %581 = vmatprep.subr.bf16.mxu0 %v630_v8  ;;  %607 = vmatprep.subr.bf16.mxu1 %v630_v8 }
  0x65   :  { %582 = vmatpush3.bf16.msra.mxu0 %v630_v8  ;;  %615 = vmatpush3.bf16.msra.mxu1 %v630_v8 }
  0x66   :  { %583 = vmatprep.subr.bf16.mxu0 %v631_v9  ;;  %608 = vmatprep.subr.bf16.mxu1 %v631_v9 }
  0x69   :  { %584 = vmatpush3.bf16.msra.mxu0 %v631_v9  ;;  %616 = vmatpush3.bf16.msra.mxu1 %v631_v9 }
  0x6c   :  { %586 = vmatmul.mubr.bf16.vlgmr.msra.gmra.mrb[0].mxu0 %v634_v10  ;;  %594 = vmatmul.mubr.bf16.vlgmr.msra.gmra.mrb[0].mxu1 %v635_v11 }
  0x6d   :  { %589 = vmatprep.mubr.bf16.mxu0 %v636_v12  ;;  %597 = vmatprep.mubr.bf16.mxu1 %v637_v13 }
  0x74   :  { %590 = vmatmul.mubr.bf16.gmra.mrb[4].mxu0 %v638_v14  ;;  %598 = vmatmul.mubr.bf16.gmra.mrb[4].mxu1 %v639_v15 }
 0x13f   :  { %v587_v17 = vpop.f32.mrb[0].mxu0  ;;  %v595_v19 = vpop.f32.mrb[0].mxu1 }
 0x140   :  { %v304_v20 = vmul.f32 %v587_v17, %v472_v16  ;;  %v312_v21 = vmul.f32 %v595_v19, %v472_v16  ;;  %v232_v22 = vpop.f32.mrb[1].mxu0  ;;  %v264_v23 = vpop.f32.mrb[1].mxu1 }
 0x141   :  { %v302_v24 = vmul.f32 %v472_v16, %v232_v22  ;;  %v310_v25 = vmul.f32 %v472_v16, %v264_v23  ;;  %v588_v26 = vpop.f32.mrb[2].mxu0  ;;  %v596_v27 = vpop.f32.mrb[2].mxu1 }
 0x142   :  { %v327_v28 = vadd.f32 %v851_v18, %v304_v20  ;;  %v335_v29 = vadd.f32 %v851_v18, %v312_v21  ;;  %v305_v30 = vmul.f32 %v588_v26, %v472_v16  ;;  %v313_v31 = vmul.f32 %v596_v27, %v472_v16  ;;  %v235_v32 = vpop.f32.mrb[3].mxu0  ;;  %v267_v33 = vpop.f32.mrb[3].mxu1 }
 0x143   :  { %v325_v34 = vadd.f32 %v851_v18, %v302_v24  ;;  %v333_v35 = vadd.f32 %v851_v18, %v310_v25  ;;  %v303_v36 = vmul.f32 %v472_v16, %v235_v32  ;;  %v311_v37 = vmul.f32 %v472_v16, %v267_v33 }
 0x144   :  { %v328_v38 = vadd.f32 %v851_v18, %v305_v30  ;;  %v336_v39 = vadd.f32 %v851_v18, %v313_v31  ;;  %v343_v42 = vmax.f32 %v327_v28, 0.0  ;;  %v351_v43 = vmax.f32 %v335_v29, 0.0 }
 0x145   :  { %v326_v40 = vadd.f32 %v851_v18, %v303_v36  ;;  %v334_v41 = vadd.f32 %v851_v18, %v311_v37  ;;  %v341_v46 = vmax.f32 %v325_v34, 0.0  ;;  %v349_v47 = vmax.f32 %v333_v35, 0.0 }
 0x146   :  { %v344_v44 = vmax.f32 %v328_v38, 0.0  ;;  %v352_v45 = vmax.f32 %v336_v39, 0.0 }
 0x147   :  { %v342_v48 = vmax.f32 %v326_v40, 0.0  ;;  %v350_v49 = vmax.f32 %v334_v41, 0.0  ;;  %v591_v50 = vpop.f32.mrb[4].mxu0  ;;  %v599_v51 = vpop.f32.mrb[4].mxu1 }
 0x148   :  { %v514_v52 = vpack.c.bf16 %v344_v44, %v343_v42  ;;  %v534_v53 = vpack.c.bf16 %v352_v45, %v351_v43  ;;  %v308_v54 = vmul.f32 %v591_v50, %v472_v16  ;;  %v316_v55 = vmul.f32 %v599_v51, %v472_v16  ;;  %v248_v56 = vpop.f32.mrb[5].mxu0  ;;  %v280_v57 = vpop.f32.mrb[5].mxu1 }
 0x149   :  { %v509_v58 = vpack.c.bf16 %v342_v48, %v341_v46  ;;  %v529_v59 = vpack.c.bf16 %v350_v49, %v349_v47  ;;  %v306_v60 = vmul.f32 %v472_v16, %v248_v56  ;;  %v314_v61 = vmul.f32 %v472_v16, %v280_v57  ;;  %v592_v62 = vpop.f32.mrb[6].mxu0  ;;  %v600_v63 = vpop.f32.mrb[6].mxu1 }
 0x14a   :  { %546 = vst [vmem:[#allocation10 + $0x8] sm:$0xff] %v514_v52   ;;  %550 = vst [vmem:[#allocation10 + $0x28] sm:$0xff] %v534_v53   ;;  %v331_v0 = vadd.f32 %v851_v18, %v308_v54  ;;  %v339_v1 = vadd.f32 %v851_v18, %v316_v55  ;;  %v309_v2 = vmul.f32 %v592_v62, %v472_v16  ;;  %v251_v4 = vpop.f32.mrb[7].mxu0  ;;  %v283_v5 = vpop.f32.mrb[7].mxu1 }
 0x14b   :  { %v317_v3 = vmul.f32 %v600_v63, %v472_v16  ;;  %510 = vst [vmem:[#allocation10] sm:$0xff] %v509_v58   ;;  %549 = vst [vmem:[#allocation10 + $0x20] sm:$0xff] %v529_v59   ;;  %v329_v6 = vadd.f32 %v851_v18, %v306_v60  ;;  %v337_v7 = vadd.f32 %v851_v18, %v314_v61 }
 0x14c   :  { %v307_v8 = vmul.f32 %v472_v16, %v251_v4  ;;  %v315_v9 = vmul.f32 %v472_v16, %v283_v5  ;;  %v332_v10 = vadd.f32 %v851_v18, %v309_v2  ;;  %v347_v14 = vmax.f32 %v331_v0, 0.0 }
 0x14d   :  { %v340_v11 = vadd.f32 %v851_v18, %v317_v3  ;;  %v355_v15 = vmax.f32 %v339_v1, 0.0  ;;  %v345_v20 = vmax.f32 %v329_v6, 0.0  ;;  %v353_v21 = vmax.f32 %v337_v7, 0.0 }
 0x14e   :  { %v330_v12 = vadd.f32 %v851_v18, %v307_v8  ;;  %v338_v13 = vadd.f32 %v851_v18, %v315_v9  ;;  %v348_v17 = vmax.f32 %v332_v10, 0.0 }
 0x14f   :  { %v356_v19 = vmax.f32 %v340_v11, 0.0 }
 0x150   :  { %v346_v22 = vmax.f32 %v330_v12, 0.0  ;;  %v354_v23 = vmax.f32 %v338_v13, 0.0  ;;  %v524_v24 = vpack.c.bf16 %v348_v17, %v347_v14 }
 0x151   :  { %v544_v16 = vpack.c.bf16 %v356_v19, %v355_v15 }
 0x152   :  { %v519_v25 = vpack.c.bf16 %v346_v22, %v345_v20  ;;  %v539_v26 = vpack.c.bf16 %v354_v23, %v353_v21  ;;  %548 = vst [vmem:[#allocation10 + $0x18] sm:$0xff] %v524_v24  }
 0x153   :  { %552 = vst [vmem:[#allocation10 + $0x38] sm:$0xff] %v544_v16  }
 0x154   :  { %547 = vst [vmem:[#allocation10 + $0x10] sm:$0xff] %v519_v25   ;;  %551 = vst [vmem:[#allocation10 + $0x30] sm:$0xff] %v539_v26  }
 0x155   :  { %739 = shalt.err (!%p736_p8)
}
 0x156   :  { %s740_s17 = scalar_lea.hbm %s888_s4, 1024 }
 0x157   :  { %p741_p9 = scmp.ne.s32.totalorder %s888_s4, %s740_s17  ;;  %p744_p10 = scmp.lt.u32.totalorder %s740_s17, %s888_s4 }
 0x159   :  { %p746_p11 = pnand %p744_p10, %p741_p9 }
 0x15b   :  { %749 = shalt.err (!%p746_p11)
}
 0x15c   :  { %448 = dma.vmem_to_hbm [thread:$0]  %s443_s13, 1024, %s888_s4, [#allocation4], %s760_s27, %s760_s27, %s761_s28  }
 0x15d   :  { %756 = dma.done.wait [#allocation4], 1024  }
 0x15e   :  { %757 = vsyncadd [#allocation4], 4294966272 }
 0x15f   :  { %452 = vsyncpa [#allocation3], 1 }
 0x160   :  { %453 = vsyncpa [#allocation6], 1 }
 0x161   :  { %454 = vsyncpa [#allocation9], 1 }
 0x162   :  { %455 = vsyncpa [#allocation4], 1 }

</bundles_post_ra>
